<compile_context>
chip_gen: v5e
topology: v5e:2x2
jax: 0.10.0
libtpu: 0.0.40
codegen_flags: <defaults>
</compile_context>

<pallas_src>
import math
import numpy as np
import jax
import jax.numpy as jnp
from jax.experimental import pallas as pl
from jax.experimental.pallas import tpu as pltpu

_LANE = 128                 # TPU lane width
_SUBLANE = 16               # bf16 sublane packing -> row tiles are multiples of 16
_MAX_ROW_TILE = 256         # MXU-height row tile when rows are plentiful
_MAX_N_TILE = 512           # lane-dense tile over the output (N) axis
_VMEM_LIMIT = 64 * 1024 * 1024


def _round_up(x, m):
    return -(-x // m) * m


def _pick_n_tile(total):
    """Largest multiple of 128 that divides `total` and is <= _MAX_N_TILE."""
    for t in range(_MAX_N_TILE, 0, -_LANE):
        if total % t == 0:
            return t
    return total


# --------------------------------------------------------------------------
# Deterministic operator construction (parameter setup / glue, plain numpy)
# --------------------------------------------------------------------------
def _spec_offset(l):
    # number of (l', m, n) coefficients with l' < l :  sum_{l'<l} (2l'+1)^2
    return l * (4 * l * l - 1) // 3


def _wigner_d(l, beta):
    """Wigner small-d matrix d^l_{mn}(beta), indexed [m+l, n+l]."""
    d = np.zeros((2 * l + 1, 2 * l + 1), dtype=np.float64)
    cb = math.cos(beta / 2.0)
    sb = math.sin(beta / 2.0)
    for mi, m in enumerate(range(-l, l + 1)):
        for ni, n in enumerate(range(-l, l + 1)):
            pref = math.sqrt(math.factorial(l + m) * math.factorial(l - m) *
                             math.factorial(l + n) * math.factorial(l - n))
            smin = max(0, n - m)
            smax = min(l + n, l - m)
            val = 0.0
            for s in range(smin, smax + 1):
                den = (math.factorial(l + n - s) * math.factorial(s) *
                       math.factorial(m - n + s) * math.factorial(l - m - s))
                val += ((-1.0) ** (m - n + s) / den *
                        cb ** (2 * l + n - m - 2 * s) * sb ** (m - n + 2 * s))
            d[mi, ni] = pref * val
    return d


def _dh_quadrature_weights(b):
    """Driscoll-Healy / SOFT quadrature weights over the 2b beta samples."""
    w = np.zeros(2 * b, dtype=np.float64)
    for j in range(2 * b):
        acc = 0.0
        for k in range(b):
            acc += (1.0 / (2 * k + 1)) * math.sin((2 * j + 1) * (2 * k + 1) * math.pi / (4 * b))
        w[j] = (2.0 / b) * math.sin(math.pi * (2 * j + 1) / (4 * b)) * acc
    return w


def _build_analysis_matrix(b_in):
    """Complex operator of so3_rfft: [ (2 b_in)^3 , nspec_in ]."""
    n = 2 * b_in
    nspec = _spec_offset(b_in)
    betas = np.pi * (2.0 * np.arange(n) + 1.0) / (4.0 * b_in)
    w = _dh_quadrature_weights(b_in) / (2.0 * n * n)   # normalised so fwd∘inv ≈ id
    grid = np.arange(n)
    A = np.zeros((nspec, n, n, n), dtype=np.complex128)
    for l in range(b_in):
        off = _spec_offset(l)
        d = np.stack([_wigner_d(l, bt) for bt in betas])          # [2b, 2l+1, 2l+1]
        for mi, m in enumerate(range(-l, l + 1)):
            e_a = np.exp(-2j * np.pi * m * grid / n)              # alpha phase
            for ni, nn in enumerate(range(-l, l + 1)):
                e_g = np.exp(-2j * np.pi * nn * grid / n)         # gamma phase
                A[off + mi * (2 * l + 1) + ni] = (
                    (w * d[:, mi, ni])[:, None, None] * e_a[:, None] * e_g[None, :])
    return A.reshape(nspec, n ** 3).T                             # [spatial_in, nspec_in]


def _build_synthesis_matrix(b_out):
    """Complex operator of SO3_ifft_real: [ nspec_out , (2 b_out)^3 ]."""
    n = 2 * b_out
    nspec = _spec_offset(b_out)
    betas = np.pi * (2.0 * np.arange(n) + 1.0) / (4.0 * b_out)
    grid = np.arange(n)
    S = np.zeros((nspec, n, n, n), dtype=np.complex128)
    for l in range(b_out):
        off = _spec_offset(l)
        d = np.stack([_wigner_d(l, bt) for bt in betas])
        for mi, m in enumerate(range(-l, l + 1)):
            e_a = np.exp(2j * np.pi * m * grid / n)
            for ni, nn in enumerate(range(-l, l + 1)):
                e_g = np.exp(2j * np.pi * nn * grid / n)
                S[off + mi * (2 * l + 1) + ni] = (
                    (2 * l + 1) * d[:, mi, ni][:, None, None] * e_a[:, None] * e_g[None, :])
    return S.reshape(nspec, n ** 3)                               # [nspec_out, spatial_out]


# --------------------------------------------------------------------------
# Pallas kernel (the single matmul hot path, used by both stages)
# --------------------------------------------------------------------------
def _matmul_kernel(x_ref, w_ref, o_ref):
    w = w_ref[...]
    x = x_ref[...].astype(w.dtype)            # bf16 x bf16 -> f32 MXU accumulation
    o_ref[...] = jnp.dot(x, w, preferred_element_type=jnp.float32).astype(o_ref.dtype)


def _tiled_matmul(x, w, out_dtype, row_tile, n_tile):
    """[R, K] @ [K, N] -> [R, N], tiled over (row tiles, lane-dense N tiles).

    K is kept whole per step (fits VMEM for practical SO(3) bandwidths); the
    weight streams in (K, n_tile) blocks so it never has to be fully resident.
    """
    R, K = x.shape
    _, N = w.shape
    grid = (R // row_tile, N // n_tile)
    flops = 2 * R * K * N
    bytes_accessed = (R * K * x.dtype.itemsize
                      + grid[0] * K * N * w.dtype.itemsize
                      + R * N * np.dtype(out_dtype).itemsize)
    return pl.pallas_call(
        _matmul_kernel,
        out_shape=jax.ShapeDtypeStruct((R, N), out_dtype),
        grid_spec=pltpu.PrefetchScalarGridSpec(
            num_scalar_prefetch=0,
            grid=grid,
            in_specs=[pl.BlockSpec((row_tile, K), lambda i, j: (i, 0)),
                      pl.BlockSpec((K, n_tile), lambda i, j: (0, j))],
            out_specs=pl.BlockSpec((row_tile, n_tile), lambda i, j: (i, j))),
        compiler_params=pltpu.CompilerParams(
            dimension_semantics=("parallel", "parallel"),
            vmem_limit_bytes=_VMEM_LIMIT),
        cost_estimate=pl.CostEstimate(flops=flops, transcendentals=0,
                                      bytes_accessed=bytes_accessed),
    )(x, w)


# --------------------------------------------------------------------------
# Module
# --------------------------------------------------------------------------
class SO3UnpoolingPallas:
    """SO(3) spectral unpooling: analysis at b_in, centred zero-pad of the
    flattened (l,m,n) spectrum to the b_out size (folded into the synthesis
    operator), synthesis at b_out."""

    def __init__(self, b_in, b_out, weight_dtype=jnp.bfloat16):
        assert b_out > b_in
        self.b_in, self.b_out = b_in, b_out
        self.s_in = (2 * b_in) ** 3
        self.s_out = (2 * b_out) ** 3
        nspec_in = _spec_offset(b_in)
        nspec_out = _spec_offset(b_out)
        self.nspec_in = nspec_in

        A = _build_analysis_matrix(b_in)      # [s_in, nspec_in]   complex
        S = _build_synthesis_matrix(b_out)    # [nspec_out, s_out] complex

        # ---- fold fftshift -> centred zero-pad -> ifftshift into a row selection ----
        # Only nspec_in rows of S ever multiply nonzero data; bake the two rolls and
        # the centred offset into the row permutation.  out = Re(X @ S_used).
        # TODO(synk): Utils.{fftshift,ifftshift,compute_bounds_SO3} sources were not
        # provided; numpy fftshift conventions and lhs = nspec_in // 2 are assumed.
        shift_in = nspec_in // 2
        shift_out = nspec_out // 2
        lhs = nspec_in // 2
        lb = nspec_out // 2 - lhs
        row_perm = np.array(
            [(lb + ((i + shift_in) % nspec_in) - shift_out) % nspec_out
             for i in range(nspec_in)], dtype=np.int64)
        S_used = S[row_perm]                  # [nspec_in, s_out] complex

        # ---- lane-dense packed real operators (Re/Im fused into one matmul each) ----
        #   analysis  W_a : [s_in, NA],  NA = 2 * nspec_pad, columns = [Re(A) | Im(A)]
        #   synthesis W_s : [NA,  NS ],  rows    = [Re(S_used) ; -Im(S_used)]
        # so   Re(x A S_used) = (x W_a) W_s  with all padding columns/rows zero.
        nspec_pad = _round_up(nspec_in, _LANE)
        self.na = 2 * nspec_pad
        self.ns = _round_up(self.s_out, _LANE)

        wa = np.zeros((self.s_in, self.na), dtype=np.float64)
        wa[:, :nspec_in] = A.real
        wa[:, nspec_pad:nspec_pad + nspec_in] = A.imag
        ws = np.zeros((self.na, self.ns), dtype=np.float64)
        ws[:nspec_in, :self.s_out] = S_used.real
        ws[nspec_pad:nspec_pad + nspec_in, :self.s_out] = -S_used.imag

        self.compute_dtype = weight_dtype
        self.wa = jnp.asarray(wa, dtype=weight_dtype)
        self.ws = jnp.asarray(ws, dtype=weight_dtype)
        self.tile_na = _pick_n_tile(self.na)
        self.tile_ns = _pick_n_tile(self.ns)

    def __call__(self, x):
        b_in, b_out = self.b_in, self.b_out
        assert x.shape[2] == 2 * b_in and x.shape[3] == 2 * b_in and x.shape[4] == 2 * b_in
        batch, feat = x.shape[0], x.shape[1]
        rows = batch * feat
        n_out = 2 * b_out

        x2 = x.reshape(rows, self.s_in).astype(jnp.float32)
        # Adaptive row tile: as close to 256 as the workload allows (MXU height),
        # without padding tiny batches up to 256 rows of wasted work.
        row_tile = min(_MAX_ROW_TILE, _round_up(rows, _SUBLANE))
        rows_p = _round_up(rows, row_tile)
        if rows_p != rows:
            x2 = jnp.pad(x2, ((0, rows_p - rows), (0, 0)))

        # Kernel 1: so3_rfft at b_in  ->  packed [Re | Im] spectrum, [rows_p, NA].
        spec = _tiled_matmul(x2, self.wa, self.compute_dtype, row_tile, self.tile_na)

        # Kernel 2: (folded) centred zero-pad + SO3_ifft_real at b_out -> [rows_p, NS].
        out2 = _tiled_matmul(spec, self.ws, jnp.float32, row_tile, self.tile_ns)

        out2 = out2[:rows, :self.s_out]
        return out2.reshape(batch, feat, n_out, n_out, n_out)


# --------------------------------------------------------------------------
# Pure numpy (float64) reference of the same forward, for validation.
# (Deliberately uses the ORIGINAL un-folded sequence: analysis -> fftshift ->
#  centred zero-pad -> ifftshift -> synthesis; this cross-checks the folded
#  row-permutation used by the Pallas path.)
# --------------------------------------------------------------------------
def _reference_forward(x_np, b_in, b_out):
    n_in, n_out = 2 * b_in, 2 * b_out
    nspec_in, nspec_out = _spec_offset(b_in), _spec_offset(b_out)
    A = _build_analysis_matrix(b_in)
    S = _build_synthesis_matrix(b_out)
    batch, feat = x_np.shape[:2]
    rows = batch * feat
    x2 = x_np.reshape(rows, n_in ** 3)
    X = x2 @ A                                     # so3_rfft (complex)
    X = np.roll(X, nspec_in // 2, axis=1)          # fftshift
    lhs = nspec_in // 2
    rhs = nspec_in - lhs
    center = nspec_out // 2
    Y = np.zeros((rows, nspec_out), dtype=np.complex128)
    Y[:, center - lhs:center + rhs] = X            # centred zero-pad
    Y = np.roll(Y, -(nspec_out // 2), axis=1)      # ifftshift
    out = np.real(Y @ S)                           # SO3_ifft_real
    return out.reshape(batch, feat, n_out, n_out, n_out)


if __name__ == "__main__":
    b_in, b_out = 2, 4
    batch, feat = 2, 4
    key = jax.random.PRNGKey(0)
    x = jax.random.normal(key, (batch, feat, 2 * b_in, 2 * b_in, 2 * b_in), dtype=jnp.float32)

    module = SO3UnpoolingPallas(b_in, b_out)
    y = jax.block_until_ready(module(x))

    assert y.shape == (batch, feat, 2 * b_out, 2 * b_out, 2 * b_out)
    assert bool(jnp.all(jnp.isfinite(y)))

    y_ref = _reference_forward(np.asarray(x, dtype=np.float64), b_in, b_out)
    np.testing.assert_allclose(np.asarray(y, dtype=np.float64), y_ref, rtol=5e-2, atol=5e-2)

    print("KERNEL_OK")
</pallas_src>

<mosaic_0001>
module attributes {stable_mosaic.version = 11 : i64} {
  func.func @_matmul_kernel(%arg0: i32, %arg1: i32, %arg2: memref<16x64xf32, #tpu.memory_space<vmem>>, %arg3: memref<64x256xbf16, #tpu.memory_space<vmem>>, %arg4: memref<16x256xbf16, #tpu.memory_space<vmem>>) attributes {dimension_semantics = [#tpu.dimension_semantics<parallel>, #tpu.dimension_semantics<parallel>], iteration_bounds = array<i64: 1, 1>, scalar_prefetch = 0 : i64, scratch_operands = 0 : i64, tpu.core_type = #tpu.core_type<tc>, window_params = [{transform_indices = @transform_0, window_bounds = array<i64: 16, 64>}, {transform_indices = @transform_1, window_bounds = array<i64: 64, 256>}, {transform_indices = @transform_2, window_bounds = array<i64: 16, 256>}]} {
    %c0 = arith.constant 0 : index
    %c0_0 = arith.constant 0 : index
    %0 = vector.load %arg3[%c0, %c0_0] : memref<64x256xbf16, #tpu.memory_space<vmem>>, vector<64x256xbf16>
    %c0_1 = arith.constant 0 : index
    %c0_2 = arith.constant 0 : index
    %1 = vector.load %arg2[%c0_1, %c0_2] : memref<16x64xf32, #tpu.memory_space<vmem>>, vector<16x64xf32>
    %2 = arith.truncf %1 : vector<16x64xf32> to vector<16x64xbf16>
    %cst = arith.constant dense<0.000000e+00> : vector<16x256xf32>
    %3 = tpu.matmul %2, %0, %cst {dimension_numbers = #tpu.dot_dimension_numbers<[1], [0], [0], [1], [0, 0, 1, 1], [], []>} : vector<16x64xbf16>, vector<64x256xbf16>, vector<16x256xf32> -> vector<16x256xf32>
    %4 = arith.truncf %3 : vector<16x256xf32> to vector<16x256xbf16>
    %c0_3 = arith.constant 0 : index
    %c0_4 = arith.constant 0 : index
    %5 = vector.load %arg4[%c0_3, %c0_4] : memref<16x256xbf16, #tpu.memory_space<vmem>>, vector<16x256xbf16>
    tpu.vector_store %arg4[%c0_3, %c0_4], %4 {strides = array<i32>} : memref<16x256xbf16, #tpu.memory_space<vmem>>, vector<16x256xbf16>,
    return
  }
  func.func @transform_0(%arg0: i32, %arg1: i32) -> (i32, i32) {
    %c0_i32 = arith.constant 0 : i32
    %c0_i32_0 = arith.constant 0 : i32
    return %arg0, %c0_i32 : i32, i32
  }
  func.func @transform_1(%arg0: i32, %arg1: i32) -> (i32, i32) {
    %c0_i32 = arith.constant 0 : i32
    %c0_i32_0 = arith.constant 0 : i32
    return %c0_i32, %arg1 : i32, i32
  }
  func.func @transform_2(%arg0: i32, %arg1: i32) -> (i32, i32) {
    %c0_i32 = arith.constant 0 : i32
    return %arg0, %arg1 : i32, i32
  }
}

</mosaic_0001>

<bundles_post_ra>
// kernel: tpu_custom_call.1
= control target key start
LH: loop header
LB: loop body
LE: loop exit
PB: predicated region body
PF: predicated region fallthrough
CT: control target
= control target key end

     0   :  { %7 = vsyncpa [#allocation3], 0  ;;  %s315_s0 = inlined_call_operand.hbm [shape: f32[16,64], index: 0, kind: input, shape index: {}]   ;;  %s316_s1 = inlined_call_operand.hbm [shape: bf16[64,256], index: 1, kind: input, shape index: {}]   ;;  %s317_s2 = inlined_call_operand.hbm [shape: bf16[16,256], index: 2, kind: output, shape index: {}]  }
   0x1   :  { %8 = vsyncpa [#allocation6], 0 }
   0x2   :  { %9 = vsyncpa [#allocation4], 0  ;;  %s14_s11 = sshll.u32 %s315_s0, 4  ;;  %s277_s12 = smov [#allocation2]   ;;  %s15_s11 = int_to_ptr.hbm [resolvable:$true] %s14_s11 }
   0x3   :  { %s16_s13 = sshll.u32 %s277_s12, 4  ;;  %s27_s16 = sshll.u32 %s316_s1, 4  ;;  %s17_s13 = int_to_ptr.vmem [resolvable:$true] %s16_s13  ;;  %s28_s16 = int_to_ptr.hbm [resolvable:$true] %s27_s16 }
   0x4   :  { %s278_s17 = smov 128   ;;  %s279_s18 = smov 8  }
   0x5   :  { %22 = dma.hbm_to_vmem [thread:$0]  %s15_s11, 256, %s17_s13, [#allocation3], %s278_s17, %s278_s17, %s279_s18  }
   0x6   :  { %s280_s19 = smov [#allocation5]  }
   0x7   :  { %s29_s20 = sshll.u32 %s280_s19, 4  ;;  %s30_s20 = int_to_ptr.vmem [resolvable:$true] %s29_s20 }
   0x8   :  { %35 = dma.hbm_to_vmem [thread:$0]  %s28_s16, 1024, %s30_s20, [#allocation6], %s278_s17, %s278_s17, %s279_s18  }
   0x9   :  { %271 = dma.done.wait [#allocation3], 256  }
   0xa   :  { %272 = vsyncadd [#allocation3], 4294967040 }
   0xb   :  { %273 = dma.done.wait [#allocation6], 1024  }
   0xc   :  { %274 = vsyncadd [#allocation6], 4294966272  ;;  %v178_v0 = vld [vmem:[#allocation5 + $0x30] sm:$0xf]  ;;  %v193_v1 = vld [vmem:[#allocation5 + $0x34] sm:$0xf0] }
   0xd   :  { %v192_v2 = vld [vmem:[#allocation5 + $0x34] sm:$0xf]  ;;  %v179_v3 = vor.u32 %v193_v1, %v178_v0  ;;  %v180_v4 = vld [vmem:[#allocation5 + $0x38] sm:$0xf0]  ;;  %v170_v5 = vld [vmem:[#allocation5 + $0x20] sm:$0xf] }
   0xe   :  { %v191_v6 = vld [vmem:[#allocation5 + $0x24] sm:$0xf0]  ;;  %v183_v7 = vor.u32 %v192_v2, %v180_v4  ;;  %v190_v8 = vld [vmem:[#allocation5 + $0x24] sm:$0xf]  ;;  %v172_v9 = vld [vmem:[#allocation5 + $0x28] sm:$0xf0] }
   0xf   :  { %104 = vmatpush.bf16.msra.mxu0 %v179_v3  ;;  %v171_v10 = vor.u32 %v191_v6, %v170_v5  ;;  %v175_v11 = vor.u32 %v190_v8, %v172_v9  ;;  %v162_v12 = vld [vmem:[#allocation5 + $0x10] sm:$0xf]  ;;  %v189_v13 = vld [vmem:[#allocation5 + $0x14] sm:$0xf0]  ;;  %v188_v14 = vld [vmem:[#allocation5 + $0x14] sm:$0xf] }
  0x10   :  { %118 = vmatpush.bf16.msra.mxu1 %v183_v7  ;;  %v164_v15 = vld [vmem:[#allocation5 + $0x18] sm:$0xf0]  ;;  %v163_v16 = vor.u32 %v189_v13, %v162_v12  ;;  %v154_v18 = vld [vmem:[#allocation5] sm:$0xf]  ;;  %v187_v19 = vld [vmem:[#allocation5 + $0x4] sm:$0xf0] }
  0x11   :  { %v167_v17 = vor.u32 %v188_v14, %v164_v15  ;;  %v186_v20 = vld [vmem:[#allocation5 + $0x4] sm:$0xf]  ;;  %v156_v21 = vld [vmem:[#allocation5 + $0x8] sm:$0xf0]  ;;  %v155_v22 = vor.u32 %v187_v19, %v154_v18  ;;  %v53_v23 = vld [vmem:[#allocation2] sm:$0xff]  ;;  %vm96_vm0 = vcmask 523264  }
  0x12   :  { %v54_v24 = vld [vmem:[#allocation2 + $0x8] sm:$0xff]  ;;  %v159_v25 = vor.u32 %v186_v20, %v156_v21  ;;  %s281_s0 = smov [#allocation7]   ;;  %s138_s23 = sshll.u32 %s317_s2, 4  ;;  %s139_s23 = int_to_ptr.hbm [resolvable:$true] %s138_s23 }
  0x13   :  { %105 = vmatpush.bf16.msra.mxu0 %v171_v10  ;;  %v55_v26 = vpack.c.bf16 %v54_v24, %v53_v23  ;;  %s136_s1 = sshll.u32 %s281_s0, 4  ;;  %s137_s1 = int_to_ptr.vmem [resolvable:$true] %s136_s1 }
  0x14   :  { %119 = vmatpush.bf16.msra.mxu1 %v175_v11 }
  0x17   :  { %106 = vmatpush.bf16.msra.mxu0 %v163_v16 }
  0x18   :  { %120 = vmatpush.bf16.msra.mxu1 %v167_v17 }
  0x1b   :  { %107 = vmatpush.bf16.msra.mxu0 %v155_v22 }
  0x1c   :  { %121 = vmatpush.bf16.msra.mxu1 %v159_v25 }
  0x1e   :  { %184 = vmatmul.msk.bf16.vlgmr.msra.gmra.mxu0 %vm96_vm0, %v55_v26 }
  0x1f   :  { %185 = vmatmul.msk.bf16.vlgmr.msra.gmra.mxu1 %vm96_vm0, %v55_v26 }
  0x9b   :  { %v109_v27 = vpop.f32.mrf.mxu0 }
  0x9c   :  { %v123_v28 = vpop.f32.mrf.mxu1 }
  0x9d   :  { %v128_v29 = vpack.c.bf16 %v123_v28, %v109_v27 }
  0x9f   :  { %130 = vst [vmem:[#allocation7] sm:$0xff] %v128_v29 }
  0xa3   :  { %v111_v30 = vpop.f32.mrf.mxu0 }
  0xa4   :  { %v125_v31 = vpop.f32.mrf.mxu1 }
  0xa5   :  { %v129_v32 = vpack.c.bf16 %v125_v31, %v111_v30 }
  0xa7   :  { %131 = vst [vmem:[#allocation7 + $0x8] sm:$0xff] %v129_v32 }
  0xa8   :  { %144 = dma.vmem_to_hbm [thread:$0]  %s137_s1, 256, %s139_s23, [#allocation4], %s278_s17, %s278_s17, %s279_s18  }
  0xa9   :  { %275 = dma.done.wait [#allocation4], 256  }
  0xaa   :  { %276 = vsyncadd [#allocation4], 4294967040 }
  0xab   :  { %149 = vsyncpa [#allocation3], 1 }
  0xac   :  { %150 = vsyncpa [#allocation6], 1 }
  0xad   :  { %151 = vsyncpa [#allocation4], 1 }

</bundles_post_ra>
